<compile_context>
chip_gen: v7x
topology: tpu7x:2x2x1
jax: 0.10.0
libtpu: 0.0.40
codegen_flags: <defaults>
</compile_context>

<pallas_src>
import math
import functools

import jax
import jax.numpy as jnp
from jax.experimental import pallas as pl
from jax.experimental.pallas import tpu as pltpu


def _round_up(x, m):
    return ((x + m - 1) // m) * m


def _lcm(a, b):
    return a * b // math.gcd(a, b)


def make_sinc_resample_kernel(orig_sr, target_sr, lowpass_filter_width=6,
                              rolloff=0.99, dtype=jnp.float32):
    """torchaudio `_get_sinc_resample_kernel` ("sinc_interp_hann"): (new, K)."""
    gcd = math.gcd(int(orig_sr), int(target_sr))
    orig = int(orig_sr) // gcd
    new = int(target_sr) // gcd
    base_freq = min(orig, new) * rolloff
    width = int(math.ceil(lowpass_filter_width * orig / base_freq))
    idx = jnp.arange(-width, width + orig, dtype=jnp.float32) / orig
    t = jnp.arange(0, -new, -1, dtype=jnp.float32)[:, None] / new + idx[None, :]
    t = t * base_freq
    t = jnp.clip(t, -lowpass_filter_width, lowpass_filter_width)
    window = jnp.cos(t * math.pi / lowpass_filter_width / 2.0) ** 2   # hann
    t = t * math.pi
    scale = base_freq / orig
    t_safe = jnp.where(t == 0, 1.0, t)
    kernels = jnp.where(t == 0, 1.0, jnp.sin(t_safe) / t_safe)
    kernels = kernels * window * scale                                # (new, K)
    return kernels.astype(dtype), width, orig, new


def _subband_weights(kernels, orig, new, F_sub, H):
    """Sub-band block-Toeplitz weights (float32), shape (F_sub*orig + H, F_sub*new).

    W[r, f*new + p] = kernels[p, r - f*orig] when 0 <= r - f*orig < K, else 0.
    Identical for every sub-band (shift invariance), so only one block is needed.
    """
    _, K = kernels.shape
    rows = F_sub * orig + H
    W_sub = F_sub * new
    col = jnp.arange(W_sub)
    f = col // new
    p = col % new
    r = jnp.arange(rows)[:, None]
    rel = r - (f * orig)[None, :]
    valid = (rel >= 0) & (rel < K)
    rel_c = jnp.clip(rel, 0, K - 1)
    p_b = jnp.broadcast_to(p[None, :], rel_c.shape)
    return jnp.where(valid, kernels[p_b, rel_c], 0.0).astype(jnp.float32)


# ----------------------------------------------------------------------------
# Tiling heuristics (VMEM-budgeted).
# ----------------------------------------------------------------------------
_TILE_VMEM_BUDGET = 18 * 1024 * 1024     # double-buffered x / halo / out blocks
_WEIGHT_VMEM_BUDGET = 6 * 1024 * 1024    # one sub-band weight block (hi+lo bf16)


def _choose_tiling(orig, new, halo, num_frames, num_wavs):
    # Halo block: 128-multiple >= filter halo; divides C by construction below.
    H = _round_up(max(halo, 1), 128)
    # F_blk alignment: C = F_blk*orig and W_out = F_blk*new multiples of 128,
    # and H | C (so the halo BlockSpec index is block-exact).
    f_align = _lcm(128 // math.gcd(orig, 128), 128 // math.gcd(new, 128))
    f_align *= H // math.gcd(f_align * orig, H)

    def tile_bytes(wb, f_blk):                 # f32, double-buffered blocks
        return 4 * 2 * wb * (f_blk * orig + H + f_blk * new)

    # Wav-row block: up to 256 (fills v6e/v7x 256-wide MXU), shrink if the minimal
    # frame block would already blow the tile budget (huge orig/new chunks).
    WB = min(256, _round_up(num_wavs, 8))
    while WB > 8 and tile_bytes(WB, f_align) > _TILE_VMEM_BUDGET:
        WB = max(8, _round_up(WB // 2, 8))

    # Frame block: hit a per-step output-lane target (bigger for small batches to
    # amortize the ~0.35us grid-step overhead), bounded by frames and VMEM budget.
    lane_target = 4096 if WB < 64 else 2048
    m = max(1, min(-(-lane_target // (f_align * new)),
                   -(-num_frames // f_align)))
    while m > 1 and tile_bytes(WB, f_align * m) > _TILE_VMEM_BUDGET:
        m -= 1
    F_blk = f_align * m

    # Sub-band (inner loop) size: shortest contraction (fewest zero MACs) subject
    # to a VMEM-resident weight, lane-worthy output bands and bounded unroll.
    best_key, best = None, (F_blk, 1)
    for n_sub in range(1, F_blk + 1):
        if F_blk % n_sub:
            continue
        F_sub = F_blk // n_sub
        if n_sub > 1 and F_sub * orig < H:     # interior slab must cover the halo
            continue
        w_bytes = 4 * (F_sub * orig + H) * (F_sub * new)
        key = (w_bytes <= _WEIGHT_VMEM_BUDGET,                     # weight fits VMEM
               F_sub * new >= 128,                                 # lane-worthy band
               n_sub <= 32,                                        # bounded unroll
               (F_sub * new) % 128 == 0 and (F_sub * orig) % 128 == 0,  # aligned
               n_sub)                                              # short contraction
        if best_key is None or key > best_key:
            best_key, best = key, (F_sub, n_sub)
    F_sub, n_sub = best
    return WB, F_blk, F_sub, n_sub, H


# ----------------------------------------------------------------------------
# Kernel.
# ----------------------------------------------------------------------------
def _split_bf16(v):
    """Split f32 -> (hi, lo) bf16 pair: v ~= hi + lo (bf16_3x / Precision.HIGH)."""
    hi = v.astype(jnp.bfloat16)
    lo = (v - hi.astype(jnp.float32)).astype(jnp.bfloat16)
    return hi, lo


def _resample_subband_kernel(x_ref, xh_ref, whi_ref, wlo_ref, o_ref, *,
                             n_sub, S, H, W_sub):
    """One (wav-block, frame-block) grid step.

    x_ref  : (WB, C)            C = n_sub*S, current input chunk (left-padded signal)
    xh_ref : (WB, H)            first H samples of the *next* chunk (halo)
    whi_ref: (S + H, W_sub)     sub-band block-Toeplitz weights, bf16 high part
    wlo_ref: (S + H, W_sub)     bf16 low part (f32 residual)
    o_ref  : (WB, n_sub*W_sub)  output block, final (wav, time) layout
    """
    def band_dot(slab_f32, whi, wlo):
        # bf16_3x: exact bf16 products, f32 accumulation; drops only the lo*lo term.
        hi, lo = _split_bf16(slab_f32)
        acc = jnp.dot(hi, whi, preferred_element_type=jnp.float32)
        acc = acc + jnp.dot(lo, whi, preferred_element_type=jnp.float32)
        acc = acc + jnp.dot(hi, wlo, preferred_element_type=jnp.float32)
        return acc

    # Interior sub-bands: one contiguous slab (body + halo) per band.
    for s in range(n_sub - 1):
        lo_col = s * S
        acc = band_dot(x_ref[:, lo_col:lo_col + S + H], whi_ref[...], wlo_ref[...])
        o_ref[:, s * W_sub:(s + 1) * W_sub] = acc.astype(o_ref.dtype)

    # Last sub-band: its halo lives in the next chunk (xh_ref).
    lo_col = (n_sub - 1) * S
    acc = band_dot(x_ref[:, lo_col:lo_col + S], whi_ref[:S, :], wlo_ref[:S, :])
    acc = acc + band_dot(xh_ref[...], whi_ref[S:, :], wlo_ref[S:, :])
    o_ref[:, (n_sub - 1) * W_sub:] = acc.astype(o_ref.dtype)


# ----------------------------------------------------------------------------
# Wrapper.
# ----------------------------------------------------------------------------
def downsample_signal(waveform, orig_sr, target_sr):
    """Equivalent of DownsampleSignal(orig_sr, target_sr)(waveform)."""
    if int(orig_sr) == int(target_sr):
        return waveform

    kernels, width, orig, new = make_sinc_resample_kernel(orig_sr, target_sr)
    K = kernels.shape[1]
    halo = K - orig                                      # = 2 * width

    shape = waveform.shape
    T = int(shape[-1])
    num_frames = T // orig + 1
    target_length = int(math.ceil(new * T / orig))

    x = waveform.reshape(-1, T).astype(jnp.float32)
    num_wavs = x.shape[0]

    WB, F_blk, F_sub, n_sub, H = _choose_tiling(orig, new, halo, num_frames, num_wavs)
    C = F_blk * orig
    W_out = F_blk * new
    S = F_sub * orig
    W_sub = F_sub * new
    n_fblocks = -(-num_frames // F_blk)
    num_wavs_pad = _round_up(num_wavs, WB)
    halo_ratio = C // H                                  # H | C by construction

    # TODO(synk): fold this edge zero-pad (left `width`, right fill) into the kernel
    # via masked first/last blocks to save one HBM pass over the input.
    padded_len = n_fblocks * C + H
    x_pad = jnp.pad(x, ((0, num_wavs_pad - num_wavs),
                        (width, padded_len - T - width)))

    w_f32 = _subband_weights(kernels, orig, new, F_sub, H)
    w_hi = w_f32.astype(jnp.bfloat16)
    w_lo = (w_f32 - w_hi.astype(jnp.float32)).astype(jnp.bfloat16)

    out_dtype = (waveform.dtype if jnp.issubdtype(waveform.dtype, jnp.floating)
                 else jnp.float32)

    # Generation-aware VMEM limit: 64 MiB on v5e/v6e (128 MiB physical), 32 MiB on
    # v7x / unknown.  Tiles + weights are budgeted to <= ~30 MiB regardless.
    try:
        vmem_cap = pltpu.get_tpu_info().vmem_capacity_bytes
    except Exception:
        vmem_cap = 64 * 1024 * 1024
    vmem_limit = int(min(96 * 2**20, max(32 * 2**20, vmem_cap // 2)))

    grid = (num_wavs_pad // WB, n_fblocks)

    out = pl.pallas_call(
        functools.partial(_resample_subband_kernel,
                          n_sub=n_sub, S=S, H=H, W_sub=W_sub),
        out_shape=jax.ShapeDtypeStruct((num_wavs_pad, n_fblocks * W_out), out_dtype),
        grid=grid,
        in_specs=[
            # current input chunk (contiguous, block-aligned)
            pl.BlockSpec((WB, C), lambda w, fb: (w, fb)),
            # halo: first H samples of the NEXT chunk (block-aligned, small)
            pl.BlockSpec((WB, H), lambda w, fb: (w, (fb + 1) * halo_ratio)),
            # tiny constant-index sub-band weights: fetched once, VMEM-resident
            pl.BlockSpec((S + H, W_sub), lambda w, fb: (0, 0)),
            pl.BlockSpec((S + H, W_sub), lambda w, fb: (0, 0)),
        ],
        out_specs=pl.BlockSpec((WB, W_out), lambda w, fb: (w, fb)),
        compiler_params=pltpu.CompilerParams(
            dimension_semantics=("parallel", "parallel"),
            vmem_limit_bytes=vmem_limit),
    )(x_pad, x_pad, w_hi, w_lo)

    # Output already in (wav, time) layout; trim + reshape fuse into a single pass.
    res = out[:num_wavs, :target_length]
    return res.reshape(shape[:-1] + (target_length,)).astype(out_dtype)


# ----------------------------------------------------------------------------
# Pure-JAX reference (mirrors torchaudio's conv1d formulation exactly).
# ----------------------------------------------------------------------------
def _reference(waveform, orig_sr, target_sr):
    kernels, width, orig, new = make_sinc_resample_kernel(orig_sr, target_sr)
    shape = waveform.shape
    T = int(shape[-1])
    x = waveform.reshape(-1, T).astype(jnp.float32)
    x = jnp.pad(x, ((0, 0), (width, width + orig)))
    out = jax.lax.conv_general_dilated(
        x[:, None, :], kernels[:, None, :], window_strides=(orig,),
        padding="VALID", dimension_numbers=("NCH", "OIH", "NCH"),
        precision=jax.lax.Precision.HIGHEST)             # (n, new, F)
    n = x.shape[0]
    out = jnp.transpose(out, (0, 2, 1)).reshape(n, -1)
    target_length = int(math.ceil(new * T / orig))
    out = out[:, :target_length]
    return out.reshape(shape[:-1] + (target_length,))


if __name__ == "__main__":
    orig_sr, target_sr = 16000, 8000                     # 2x downsample
    key1, key2 = jax.random.split(jax.random.PRNGKey(0))

    # Case 1: small shape -> single frame block / single sub-band path.
    w1 = jax.random.normal(key1, (2, 4, 128), dtype=jnp.float32)
    out1 = jax.block_until_ready(downsample_signal(w1, orig_sr, target_sr))
    ref1 = _reference(w1, orig_sr, target_sr)
    assert out1.shape == (2, 4, 64), out1.shape
    err1 = float(jnp.max(jnp.abs(out1 - ref1)))
    assert err1 < 1e-3, f"case1 mismatch, max abs err={err1}"

    # Case 2: longer signal -> multi sub-band inner loop + 2 frame blocks (halo path).
    w2 = jax.random.normal(key2, (1, 2, 12288), dtype=jnp.float32)
    out2 = jax.block_until_ready(downsample_signal(w2, orig_sr, target_sr))
    ref2 = _reference(w2, orig_sr, target_sr)
    assert out2.shape == (1, 2, 6144), out2.shape
    err2 = float(jnp.max(jnp.abs(out2 - ref2)))
    assert err2 < 1e-3, f"case2 mismatch, max abs err={err2}"

    print("KERNEL_OK")
</pallas_src>

<mosaic_0001>
module attributes {stable_mosaic.version = 11 : i64} {
  func.func @_resample_subband_kernel(%arg0: i32, %arg1: i32, %arg2: memref<8x256xf32, #tpu.memory_space<vmem>>, %arg3: memref<8x128xf32, #tpu.memory_space<vmem>>, %arg4: memref<384x128xbf16, #tpu.memory_space<vmem>>, %arg5: memref<384x128xbf16, #tpu.memory_space<vmem>>, %arg6: memref<8x128xf32, #tpu.memory_space<vmem>>) attributes {dimension_semantics = [#tpu.dimension_semantics<parallel>, #tpu.dimension_semantics<parallel>], iteration_bounds = array<i64: 1, 1>, scalar_prefetch = 0 : i64, scratch_operands = 0 : i64, tpu.core_type = #tpu.core_type<tc>, window_params = [{transform_indices = @transform_0, window_bounds = array<i64: 8, 256>}, {transform_indices = @transform_1, window_bounds = array<i64: 8, 128>}, {pipeline_mode = #tpu.pipeline_mode<synchronous>, transform_indices = @transform_2, window_bounds = array<i64: 384, 128>}, {pipeline_mode = #tpu.pipeline_mode<synchronous>, transform_indices = @transform_3, window_bounds = array<i64: 384, 128>}, {transform_indices = @transform_4, window_bounds = array<i64: 8, 128>}]} {
    %c0 = arith.constant 0 : index
    %c0_0 = arith.constant 0 : index
    %0 = vector.load %arg2[%c0, %c0_0] : memref<8x256xf32, #tpu.memory_space<vmem>>, vector<8x256xf32>
    %c0_1 = arith.constant 0 : index
    %c0_2 = arith.constant 0 : index
    %1 = vector.load %arg4[%c0_1, %c0_2] : memref<384x128xbf16, #tpu.memory_space<vmem>>, vector<256x128xbf16>
    %c0_3 = arith.constant 0 : index
    %c0_4 = arith.constant 0 : index
    %2 = vector.load %arg5[%c0_3, %c0_4] : memref<384x128xbf16, #tpu.memory_space<vmem>>, vector<256x128xbf16>
    %3 = arith.truncf %0 : vector<8x256xf32> to vector<8x256xbf16>
    %4 = arith.extf %3 : vector<8x256xbf16> to vector<8x256xf32>
    %5 = arith.subf %0, %4 : vector<8x256xf32>
    %6 = arith.truncf %5 : vector<8x256xf32> to vector<8x256xbf16>
    %cst = arith.constant dense<0.000000e+00> : vector<8x128xf32>
    %7 = tpu.matmul %3, %1, %cst {dimension_numbers = #tpu.dot_dimension_numbers<[1], [0], [0], [1], [0, 0, 1, 1], [], []>} : vector<8x256xbf16>, vector<256x128xbf16>, vector<8x128xf32> -> vector<8x128xf32>
    %cst_5 = arith.constant dense<0.000000e+00> : vector<8x128xf32>
    %8 = tpu.matmul %6, %1, %cst_5 {dimension_numbers = #tpu.dot_dimension_numbers<[1], [0], [0], [1], [0, 0, 1, 1], [], []>} : vector<8x256xbf16>, vector<256x128xbf16>, vector<8x128xf32> -> vector<8x128xf32>
    %9 = arith.addf %7, %8 : vector<8x128xf32>
    %cst_6 = arith.constant dense<0.000000e+00> : vector<8x128xf32>
    %10 = tpu.matmul %3, %2, %cst_6 {dimension_numbers = #tpu.dot_dimension_numbers<[1], [0], [0], [1], [0, 0, 1, 1], [], []>} : vector<8x256xbf16>, vector<256x128xbf16>, vector<8x128xf32> -> vector<8x128xf32>
    %11 = arith.addf %9, %10 : vector<8x128xf32>
    %c0_7 = arith.constant 0 : index
    %c0_8 = arith.constant 0 : index
    %12 = vector.load %arg3[%c0_7, %c0_8] : memref<8x128xf32, #tpu.memory_space<vmem>>, vector<8x128xf32>
    %c256 = arith.constant 256 : index
    %c0_9 = arith.constant 0 : index
    %13 = vector.load %arg4[%c256, %c0_9] : memref<384x128xbf16, #tpu.memory_space<vmem>>, vector<128x128xbf16>
    %c256_10 = arith.constant 256 : index
    %c0_11 = arith.constant 0 : index
    %14 = vector.load %arg5[%c256_10, %c0_11] : memref<384x128xbf16, #tpu.memory_space<vmem>>, vector<128x128xbf16>
    %15 = arith.truncf %12 : vector<8x128xf32> to vector<8x128xbf16>
    %16 = arith.extf %15 : vector<8x128xbf16> to vector<8x128xf32>
    %17 = arith.subf %12, %16 : vector<8x128xf32>
    %18 = arith.truncf %17 : vector<8x128xf32> to vector<8x128xbf16>
    %cst_12 = arith.constant dense<0.000000e+00> : vector<8x128xf32>
    %19 = tpu.matmul %15, %13, %cst_12 {dimension_numbers = #tpu.dot_dimension_numbers<[1], [0], [0], [1], [0, 0, 1, 1], [], []>} : vector<8x128xbf16>, vector<128x128xbf16>, vector<8x128xf32> -> vector<8x128xf32>
    %cst_13 = arith.constant dense<0.000000e+00> : vector<8x128xf32>
    %20 = tpu.matmul %18, %13, %cst_13 {dimension_numbers = #tpu.dot_dimension_numbers<[1], [0], [0], [1], [0, 0, 1, 1], [], []>} : vector<8x128xbf16>, vector<128x128xbf16>, vector<8x128xf32> -> vector<8x128xf32>
    %21 = arith.addf %19, %20 : vector<8x128xf32>
    %cst_14 = arith.constant dense<0.000000e+00> : vector<8x128xf32>
    %22 = tpu.matmul %15, %14, %cst_14 {dimension_numbers = #tpu.dot_dimension_numbers<[1], [0], [0], [1], [0, 0, 1, 1], [], []>} : vector<8x128xbf16>, vector<128x128xbf16>, vector<8x128xf32> -> vector<8x128xf32>
    %23 = arith.addf %21, %22 : vector<8x128xf32>
    %24 = arith.addf %11, %23 : vector<8x128xf32>
    %c0_15 = arith.constant 0 : index
    %c0_16 = arith.constant 0 : index
    %25 = vector.load %arg6[%c0_15, %c0_16] : memref<8x128xf32, #tpu.memory_space<vmem>>, vector<8x128xf32>
    tpu.vector_store %arg6[%c0_15, %c0_16], %24 {strides = array<i32>} : memref<8x128xf32, #tpu.memory_space<vmem>>, vector<8x128xf32>,
    return
  }
  func.func @transform_0(%arg0: i32, %arg1: i32) -> (i32, i32) {
    %c0_i32 = arith.constant 0 : i32
    return %arg0, %arg1 : i32, i32
  }
  func.func @transform_1(%arg0: i32, %arg1: i32) -> (i32, i32) {
    %c1_i32 = arith.constant 1 : i32
    %0 = arith.addi %arg1, %c1_i32 : i32
    %c2_i32 = arith.constant 2 : i32
    %1 = arith.muli %0, %c2_i32 : i32
    %c0_i32 = arith.constant 0 : i32
    return %arg0, %1 : i32, i32
  }
  func.func @transform_2(%arg0: i32, %arg1: i32) -> (i32, i32) {
    %c0_i32 = arith.constant 0 : i32
    %c0_i32_0 = arith.constant 0 : i32
    %c0_i32_1 = arith.constant 0 : i32
    return %c0_i32, %c0_i32_0 : i32, i32
  }
  func.func @transform_3(%arg0: i32, %arg1: i32) -> (i32, i32) {
    %c0_i32 = arith.constant 0 : i32
    %c0_i32_0 = arith.constant 0 : i32
    %c0_i32_1 = arith.constant 0 : i32
    return %c0_i32, %c0_i32_0 : i32, i32
  }
  func.func @transform_4(%arg0: i32, %arg1: i32) -> (i32, i32) {
    %c0_i32 = arith.constant 0 : i32
    return %arg0, %arg1 : i32, i32
  }
}

</mosaic_0001>

<bundles_post_ra>
// kernel: tpu_custom_call.1
= control target key start
LH: loop header
LB: loop body
LE: loop exit
PB: predicated region body
PF: predicated region fallthrough
CT: control target
= control target key end

     0   :  { %9 = vsyncpa [#allocation3], 0  ;;  %s1258_s0 = inlined_call_operand.hbm [shape: f32[8,384], index: 0, kind: input, shape index: {}]   ;;  %s1259_s1 = inlined_call_operand.hbm [shape: f32[8,384], index: 1, kind: input, shape index: {}]   ;;  %s1260_s2 = inlined_call_operand.hbm [shape: bf16[384,128], index: 2, kind: input, shape index: {}]   ;;  %s1261_s3 = inlined_call_operand.hbm [shape: bf16[384,128], index: 3, kind: input, shape index: {}]   ;;  %s1262_s4 = inlined_call_operand.hbm [shape: f32[8,128], index: 4, kind: output, shape index: {}]  }
   0x1   :  { %10 = vsyncpa [#allocation6], 0 }
   0x2   :  { %11 = vsyncpa [#allocation9], 0  ;;  %s736_s17 = scalar_lea.hbm %s1259_s1, 256 }
   0x3   :  { %12 = vsyncpa [#allocation4], 0  ;;  %s1116_s18 = smov [#allocation5]   ;;  %s1117_s20 = smov [#allocation2]  }
   0x4   :  { %s33_s19 = sshll.u32 %s1116_s18, 4  ;;  %s19_s21 = sshll.u32 %s1117_s20, 4  ;;  %s34_s19 = int_to_ptr.vmem [resolvable:$true] %s33_s19  ;;  %s20_s21 = int_to_ptr.vmem [resolvable:$true] %s19_s21 }
   0x5   :  { %s1019_s24 = scalar_lea.hbm %s1259_s1, 384  ;;  %p998_p1 = scmp.lt.u32.totalorder %s736_s17, %s1259_s1 }
   0x6   :  { %p996_p0 = scmp.ne.s32.totalorder %s736_s17, %s1019_s24  ;;  %p999_p2 = scmp.lt.u32.totalorder %s1019_s24, %s1019_s24 }
   0x7   :  { %p1001_p4 = scmp.lt.u32.totalorder %s1019_s24, %s736_s17 }
   0x8   :  { %p1000_p3 = por %p999_p2, %p998_p1 }
   0xa   :  { %p1002_p5 = por %p1001_p4, %p1000_p3 }
   0xc   :  { %p1003_p6 = pnand %p1002_p5, %p996_p0 }
   0xe   :  { %1006 = shalt.err (!%p1003_p6)
}
   0xf   :  { %s1007_s27 = scalar_lea.vmem %s34_s19, 128  ;;  %p1012_p8 = scmp.lt.s32.totalorder %s34_s19, %s34_s19 }
  0x10   :  { %p1008_p7 = scmp.ne.s32.totalorder %s34_s19, %s1007_s27  ;;  %p1013_p9 = scmp.lt.s32.totalorder %s1007_s27, %s1007_s27 }
  0x12   :  { %p1014_p10 = por %p1013_p9, %p1012_p8 }
  0x14   :  { %p1015_p11 = pnand %p1014_p10, %p1008_p7 }
  0x16   :  { %1018 = shalt.err (!%p1015_p11)
}
  0x17   :  { %36 = dma.hbm_to_vmem [thread:$0]  %s736_s17, 128, %s34_s19, [#allocation6]  }
  0x18   :  { %s1020_s30 = scalar_lea.hbm %s1258_s0, 256  ;;  %s1022_s8 = scalar_lea.hbm %s1258_s0, 384 }
  0x19   :  { %p1021_p12 = scmp.ne.s32.totalorder %s1258_s0, %s1020_s30  ;;  %p1023_p13 = scmp.lt.u32.totalorder %s1022_s8, %s1020_s30 }
  0x1a   :  { %p1024_p0 = scmp.lt.u32.totalorder %s1020_s30, %s1258_s0 }
  0x1c   :  { %p1025_p1 = por %p1024_p0, %p1023_p13 }
  0x1e   :  { %p1026_p2 = pnand %p1025_p1, %p1021_p12 }
  0x20   :  { %1029 = shalt.err (!%p1026_p2)
}
  0x21   :  { %s1030_s11 = scalar_lea.vmem %s20_s21, 256  ;;  %p1035_p4 = scmp.lt.s32.totalorder %s20_s21, %s20_s21 }
  0x22   :  { %p1031_p3 = scmp.ne.s32.totalorder %s20_s21, %s1030_s11  ;;  %p1036_p5 = scmp.lt.s32.totalorder %s1030_s11, %s1030_s11 }
  0x24   :  { %p1037_p6 = por %p1036_p5, %p1035_p4 }
  0x26   :  { %p1038_p7 = pnand %p1037_p6, %p1031_p3 }
  0x28   :  { %1041 = shalt.err (!%p1038_p7)
}
  0x29   :  { %22 = dma.hbm_to_vmem [thread:$0]  %s1258_s0, 256, %s20_s21, [#allocation3]  }
  0x2a   :  { %s1118_s14 = smov [#allocation7]   ;;  %s1042_s18 = scalar_lea.hbm %s1260_s2, 3072 }
  0x2b   :  { %s42_s15 = sshll.u32 %s1118_s14, 4  ;;  %p1043_p8 = scmp.ne.s32.totalorder %s1260_s2, %s1042_s18  ;;  %s43_s15 = int_to_ptr.vmem [resolvable:$true] %s42_s15 }
  0x2c   :  { %p1046_p9 = scmp.lt.u32.totalorder %s1042_s18, %s1260_s2 }
  0x2e   :  { %p1048_p10 = pnand %p1046_p9, %p1043_p8 }
  0x30   :  { %1051 = shalt.err (!%p1048_p10)
}
  0x31   :  { %s1052_s24 = scalar_lea.vmem %s43_s15, 3072  ;;  %p1057_p12 = scmp.lt.s32.totalorder %s43_s15, %s43_s15 }
  0x32   :  { %p1053_p11 = scmp.ne.s32.totalorder %s43_s15, %s1052_s24  ;;  %p1058_p13 = scmp.lt.s32.totalorder %s1052_s24, %s1052_s24 }
  0x34   :  { %p1059_p0 = por %p1058_p13, %p1057_p12 }
  0x36   :  { %p1060_p1 = pnand %p1059_p0, %p1053_p11 }
  0x38   :  { %1063 = shalt.err (!%p1060_p1)
}
  0x39   :  { %s1119_s0 = smov 64   ;;  %s1120_s21 = smov 4  }
  0x3a   :  { %48 = dma.hbm_to_vmem [thread:$0]  %s1260_s2, 3072, %s43_s15, [#allocation6], %s1119_s0, %s1119_s0, %s1120_s21  }
  0x3b   :  { %s1121_s27 = smov [#allocation8]   ;;  %s1064_s1 = scalar_lea.hbm %s1261_s3, 3072 }
  0x3c   :  { %s54_s28 = sshll.u32 %s1121_s27, 4  ;;  %p1065_p2 = scmp.ne.s32.totalorder %s1261_s3, %s1064_s1  ;;  %s55_s28 = int_to_ptr.vmem [resolvable:$true] %s54_s28 }
  0x3d   :  { %p1068_p3 = scmp.lt.u32.totalorder %s1064_s1, %s1261_s3 }
  0x3f   :  { %p1070_p4 = pnand %p1068_p3, %p1065_p2 }
  0x41   :  { %1073 = shalt.err (!%p1070_p4)
}
  0x42   :  { %s1074_s9 = scalar_lea.vmem %s55_s28, 3072  ;;  %p1079_p6 = scmp.lt.s32.totalorder %s55_s28, %s55_s28 }
  0x43   :  { %p1075_p5 = scmp.ne.s32.totalorder %s55_s28, %s1074_s9  ;;  %p1080_p7 = scmp.lt.s32.totalorder %s1074_s9, %s1074_s9 }
  0x45   :  { %p1081_p8 = por %p1080_p7, %p1079_p6 }
  0x47   :  { %p1082_p9 = pnand %p1081_p8, %p1075_p5 }
  0x49   :  { %1085 = shalt.err (!%p1082_p9)
}
  0x4a   :  { %60 = dma.hbm_to_vmem [thread:$0]  %s1261_s3, 3072, %s55_s28, [#allocation9], %s1119_s0, %s1119_s0, %s1120_s21  }
  0x4b   :  { %1108 = dma.done.wait [#allocation3], 256  }
  0x4c   :  { %1109 = vsyncadd [#allocation3], 4294967040 }
  0x4d   :  { %1110 = dma.done.wait [#allocation6], 3200  }
  0x4e   :  { %1111 = vsyncadd [#allocation6], 4294964096 }
  0x4f   :  { %1112 = dma.done.wait [#allocation9], 3072  }
  0x50   :  { %1113 = vsyncadd [#allocation9], 4294964224  ;;  %v947_v0 = vld [vmem:[#allocation7 + $0x40] sm:$0xff]   ;;  %v949_v2 = vld [vmem:[#allocation7 + $0x48] sm:$0xff]   ;;  %v1122_v29 = vmov 0.0   ;;  %vm1123_vm0 = vmmov 0  }
  0x51   :  { %v948_v1 = vld [vmem:[#allocation7] sm:$0xff]   ;;  %785 = vmatprep.subr.bf16.mxu0 %v947_v0  ;;  %807 = vmatprep.subr.bf16.mxu1 %v947_v0  ;;  %v950_v3 = vld [vmem:[#allocation7 + $0x8] sm:$0xff]   ;;  %v951_v4 = vld [vmem:[#allocation7 + $0x50] sm:$0xff]   ;;  %s1124_s3 = smov [#allocation10]  }
  0x52   :  { %786 = vmatpush3.bf16.msra.mxu0 %v948_v1  ;;  %808 = vmatpush3.bf16.msra.mxu1 %v948_v1  ;;  %v952_v5 = vld [vmem:[#allocation7 + $0x10] sm:$0xff]   ;;  %v953_v6 = vld [vmem:[#allocation7 + $0x58] sm:$0xff]   ;;  %v955_v8 = vld [vmem:[#allocation7 + $0x60] sm:$0xff]   ;;  %s725_s11 = sshll.u32 %s1124_s3, 4  ;;  %s726_s11 = int_to_ptr.vmem [resolvable:$true] %s725_s11 }
  0x53   :  { %787 = vmatprep.subr.bf16.mxu0 %v949_v2  ;;  %809 = vmatprep.subr.bf16.mxu1 %v949_v2  ;;  %v954_v7 = vld [vmem:[#allocation7 + $0x18] sm:$0xff]   ;;  %v956_v9 = vld [vmem:[#allocation7 + $0x20] sm:$0xff]   ;;  %v957_v10 = vld [vmem:[#allocation7 + $0x68] sm:$0xff]   ;;  %s1086_s12 = scalar_lea.vmem %s726_s11, 128  ;;  %p1091_p11 = scmp.lt.s32.totalorder %s726_s11, %s726_s11 }
  0x54   :  { %v77_v11 = vld [vmem:[#allocation2 + $0x8] sm:$0xff]  ;;  %v76_v12 = vld [vmem:[#allocation2] sm:$0xff]  ;;  %v961_v22 = vld [vmem:[#allocation7 + $0x78] sm:$0xff]   ;;  %p1087_p10 = scmp.ne.s32.totalorder %s726_s11, %s1086_s12  ;;  %p1092_p12 = scmp.lt.s32.totalorder %s1086_s12, %s1086_s12 }
  0x55   :  { %v143_v13 = vpack.c.bf16 %v77_v11, %v77_v11  ;;  %v1198_v14 = vpack.c.bf16 %v76_v12, %v76_v12  ;;  %v958_v15 = vld [vmem:[#allocation7 + $0x28] sm:$0xff]   ;;  %v959_v17 = vld [vmem:[#allocation7 + $0x70] sm:$0xff]   ;;  %v962_v24 = vld [vmem:[#allocation7 + $0x38] sm:$0xff]  }
  0x56   :  { %788 = vmatpush3.bf16.msra.mxu0 %v950_v3  ;;  %810 = vmatpush3.bf16.msra.mxu1 %v950_v3  ;;  %v960_v20 = vld [vmem:[#allocation7 + $0x30] sm:$0xff]   ;;  %v963_v25 = vld [vmem:[#allocation8 + $0x40] sm:$0xff]   ;;  %v966_v30 = vld [vmem:[#allocation8 + $0x48] sm:$0xff]   ;;  %p1093_p13 = por %p1092_p12, %p1091_p11 }
  0x57   :  { %789 = vmatprep.subr.bf16.mxu0 %v951_v4  ;;  %811 = vmatprep.subr.bf16.mxu1 %v951_v4  ;;  %v145_v16 = vunpack.c.l.bf16 %v143_v13  ;;  %v144_v19 = vunpack.c.l.bf16 %v1198_v14  ;;  %v964_v27 = vld [vmem:[#allocation8] sm:$0xff]   ;;  %v967_v31 = vld [vmem:[#allocation8 + $0x8] sm:$0xff]   ;;  %v969_v33 = vld [vmem:[#allocation8 + $0x50] sm:$0xff]  }
  0x58   :  { %318 = vmatprep.mubr.bf16.mxu1 %v143_v13  ;;  %v1201_v28 = vld [vmem:[#allocation7 + $0x80] sm:$0xff]   ;;  %v1206_v32 = vld [vmem:[#allocation7 + $0x88] sm:$0xff]   ;;  %v970_v34 = vld [vmem:[#allocation8 + $0x10] sm:$0xff]   ;;  %p1094_p0 = pnand %p1093_p13, %p1087_p10 }
  0x59   :  { %v147_v18 = vsub.f32 %v77_v11, %v145_v16  ;;  %v146_v23 = vsub.f32 %v76_v12, %v144_v19  ;;  %v971_v35 = vld [vmem:[#allocation7 + $0x90] sm:$0xff]   ;;  %v972_v36 = vld [vmem:[#allocation8 + $0x58] sm:$0xff]   ;;  %v975_v39 = vld [vmem:[#allocation8 + $0x60] sm:$0xff]  }
  0x5a   :  { %790 = vmatpush3.bf16.msra.mxu0 %v952_v5  ;;  %812 = vmatpush3.bf16.msra.mxu1 %v952_v5  ;;  %v973_v37 = vld [vmem:[#allocation8 + $0x18] sm:$0xff]   ;;  %v976_v40 = vld [vmem:[#allocation8 + $0x20] sm:$0xff]   ;;  %v978_v43 = vld [vmem:[#allocation8 + $0x68] sm:$0xff]  }
  0x5b   :  { %791 = vmatprep.subr.bf16.mxu0 %v953_v6  ;;  %813 = vmatprep.subr.bf16.mxu1 %v953_v6  ;;  %v149_v21 = vpack.c.bf16 %v147_v18, %v147_v18  ;;  %v148_v26 = vpack.c.bf16 %v146_v23, %v146_v23  ;;  %v974_v38 = vld [vmem:[#allocation7 + $0x98] sm:$0xff]   ;;  %v977_v41 = vld [vmem:[#allocation7 + $0xa0] sm:$0xff]   ;;  %v979_v45 = vld [vmem:[#allocation8 + $0x28] sm:$0xff]  }
  0x5c   :  { %v463_v42 = vld [vmem:[#allocation5] sm:$0xff]  ;;  %v980_v46 = vld [vmem:[#allocation7 + $0xa8] sm:$0xff]   ;;  %v981_v47 = vld [vmem:[#allocation8 + $0x70] sm:$0xff]  }
  0x5d   :  { %278 = vmatprep.mubr.bf16.mxu0 %v149_v21  ;;  %v1215_v44 = vpack.c.bf16 %v463_v42, %v463_v42  ;;  %v982_v49 = vld [vmem:[#allocation8 + $0x30] sm:$0xff]   ;;  %v984_v51 = vld [vmem:[#allocation8 + $0x78] sm:$0xff]   ;;  %v987_v56 = vld [vmem:[#allocation8 + $0x80] sm:$0xff]  }
  0x5e   :  { %792 = vmatpush3.bf16.msra.mxu0 %v954_v7  ;;  %814 = vmatpush3.bf16.msra.mxu1 %v954_v7  ;;  %v983_v50 = vld [vmem:[#allocation7 + $0xb0] sm:$0xff]   ;;  %v985_v53 = vld [vmem:[#allocation8 + $0x38] sm:$0xff]   ;;  %v988_v57 = vld [vmem:[#allocation8 + $0x88] sm:$0xff]  }
  0x5f   :  { %793 = vmatprep.subr.bf16.mxu0 %v955_v8  ;;  %815 = vmatprep.subr.bf16.mxu1 %v955_v8  ;;  %v497_v48 = vunpack.c.l.bf16 %v1215_v44  ;;  %v986_v54 = vld [vmem:[#allocation7 + $0xb8] sm:$0xff]   ;;  %v989_v58 = vld [vmem:[#allocation8 + $0x90] sm:$0xff]   ;;  %v991_v60 = vld [vmem:[#allocation8 + $0xa0] sm:$0xff]  }
  0x60   :  { %v990_v59 = vld [vmem:[#allocation8 + $0x98] sm:$0xff]   ;;  %v992_v61 = vld [vmem:[#allocation8 + $0xa8] sm:$0xff]   ;;  %v993_v62 = vld [vmem:[#allocation8 + $0xb0] sm:$0xff]  }
  0x61   :  { %v498_v52 = vsub.f32 %v463_v42, %v497_v48  ;;  %v994_v63 = vld [vmem:[#allocation8 + $0xb8] sm:$0xff]  }
  0x62   :  { %794 = vmatpush3.bf16.msra.mxu0 %v956_v9  ;;  %816 = vmatpush3.bf16.msra.mxu1 %v956_v9 }
  0x63   :  { %795 = vmatprep.subr.bf16.mxu0 %v957_v10  ;;  %817 = vmatprep.subr.bf16.mxu1 %v957_v10  ;;  %v499_v55 = vpack.c.bf16 %v498_v52, %v498_v52 }
  0x66   :  { %796 = vmatpush3.bf16.msra.mxu0 %v958_v15  ;;  %818 = vmatpush3.bf16.msra.mxu1 %v958_v15 }
  0x67   :  { %797 = vmatprep.subr.bf16.mxu0 %v959_v17  ;;  %819 = vmatprep.subr.bf16.mxu1 %v959_v17 }
  0x6a   :  { %798 = vmatpush3.bf16.msra.mxu0 %v960_v20  ;;  %820 = vmatpush3.bf16.msra.mxu1 %v960_v20 }
  0x6b   :  { %799 = vmatprep.subr.bf16.mxu0 %v961_v22  ;;  %821 = vmatprep.subr.bf16.mxu1 %v961_v22 }
  0x6e   :  { %800 = vmatpush3.bf16.msra.mxu0 %v962_v24  ;;  %822 = vmatpush3.bf16.msra.mxu1 %v962_v24 }
  0x6f   :  { %829 = vmatprep.subr.bf16.mxu0 %v963_v25  ;;  %878 = vmatprep.subr.bf16.mxu1 %v1122_v29 }
  0x71   :  { %279 = vmatmul.mubr.bf16.vlgmr.msra.gmra.mrb[0].mxu0 %v148_v26  ;;  %319 = vmatmul.mubr.bf16.vlgmr.msra.gmra.mrb[0].mxu1 %v1198_v14 }
  0x72   :  { %830 = vmatpush3.bf16.msra.mxu0 %v964_v27  ;;  %879 = vmatpush3.bf16.msra.mxu1 %v1201_v28 }
  0x73   :  { %831 = vmatprep.subr.bf16.mxu0 %v966_v30  ;;  %880 = vmatprep.subr.bf16.mxu1 %v1122_v29 }
  0x74   :  { %454 = vmatprep.mubr.bf16.mxu0 %v143_v13  ;;  %894 = vmatprep.mubr.msk.bf16.mxu1 %vm1123_vm0, %v1122_v29 }
  0x76   :  { %832 = vmatpush3.bf16.msra.mxu0 %v967_v31  ;;  %881 = vmatpush3.bf16.msra.mxu1 %v1206_v32 }
  0x77   :  { %833 = vmatprep.subr.bf16.mxu0 %v969_v33  ;;  %882 = vmatprep.subr.bf16.mxu1 %v1122_v29 }
  0x7a   :  { %834 = vmatpush3.bf16.msra.mxu0 %v970_v34  ;;  %883 = vmatpush3.bf16.msra.mxu1 %v971_v35 }
  0x7b   :  { %835 = vmatprep.subr.bf16.mxu0 %v972_v36  ;;  %884 = vmatprep.subr.bf16.mxu1 %v1122_v29 }
  0x7e   :  { %836 = vmatpush3.bf16.msra.mxu0 %v973_v37  ;;  %885 = vmatpush3.bf16.msra.mxu1 %v974_v38 }
  0x7f   :  { %837 = vmatprep.subr.bf16.mxu0 %v975_v39  ;;  %886 = vmatprep.subr.bf16.mxu1 %v1122_v29 }
  0x82   :  { %838 = vmatpush3.bf16.msra.mxu0 %v976_v40  ;;  %887 = vmatpush3.bf16.msra.mxu1 %v977_v41 }
  0x83   :  { %839 = vmatprep.subr.bf16.mxu0 %v978_v43  ;;  %888 = vmatprep.subr.bf16.mxu1 %v1122_v29 }
  0x86   :  { %840 = vmatpush3.bf16.msra.mxu0 %v979_v45  ;;  %889 = vmatpush3.bf16.msra.mxu1 %v980_v46 }
  0x87   :  { %841 = vmatprep.subr.bf16.mxu0 %v981_v47  ;;  %890 = vmatprep.subr.bf16.mxu1 %v1122_v29 }
  0x8a   :  { %842 = vmatpush3.bf16.msra.mxu0 %v982_v49  ;;  %891 = vmatpush3.bf16.msra.mxu1 %v983_v50 }
  0x8b   :  { %843 = vmatprep.subr.bf16.mxu0 %v984_v51  ;;  %892 = vmatprep.subr.bf16.mxu1 %v1122_v29 }
  0x8e   :  { %844 = vmatpush3.bf16.msra.mxu0 %v985_v53  ;;  %893 = vmatpush3.bf16.msra.mxu1 %v986_v54 }
  0x8f   :  { %898 = vmatprep.subr.bf16.mxu0 %v1122_v29  ;;  %918 = vmatprep.subr.bf16.mxu1 %v1122_v29 }
  0x91   :  { %455 = vmatmul.mubr.bf16.vlgmr.msra.gmra.mrb[4].mxu0 %v1198_v14  ;;  %895 = vmatmul.mubr.bf16.vlgmr.msra.gmra.mrb[4].mxu1 %v499_v55 }
  0x92   :  { %899 = vmatpush3.bf16.msra.mxu0 %v1201_v28  ;;  %919 = vmatpush3.bf16.msra.mxu1 %v987_v56 }
  0x93   :  { %900 = vmatprep.subr.bf16.mxu0 %v1122_v29  ;;  %920 = vmatprep.subr.bf16.mxu1 %v1122_v29 }
  0x94   :  { %914 = vmatprep.mubr.msk.bf16.mxu0 %vm1123_vm0, %v1122_v29  ;;  %934 = vmatprep.mubr.msk.bf16.mxu1 %vm1123_vm0, %v1122_v29 }
  0x96   :  { %901 = vmatpush3.bf16.msra.mxu0 %v1206_v32  ;;  %921 = vmatpush3.bf16.msra.mxu1 %v988_v57 }
  0x97   :  { %902 = vmatprep.subr.bf16.mxu0 %v1122_v29  ;;  %922 = vmatprep.subr.bf16.mxu1 %v1122_v29 }
  0x9a   :  { %903 = vmatpush3.bf16.msra.mxu0 %v971_v35  ;;  %923 = vmatpush3.bf16.msra.mxu1 %v989_v58 }
  0x9b   :  { %904 = vmatprep.subr.bf16.mxu0 %v1122_v29  ;;  %924 = vmatprep.subr.bf16.mxu1 %v1122_v29 }
  0x9e   :  { %905 = vmatpush3.bf16.msra.mxu0 %v974_v38  ;;  %925 = vmatpush3.bf16.msra.mxu1 %v990_v59 }
  0x9f   :  { %906 = vmatprep.subr.bf16.mxu0 %v1122_v29  ;;  %926 = vmatprep.subr.bf16.mxu1 %v1122_v29 }
  0xa2   :  { %907 = vmatpush3.bf16.msra.mxu0 %v977_v41  ;;  %927 = vmatpush3.bf16.msra.mxu1 %v991_v60 }
  0xa3   :  { %908 = vmatprep.subr.bf16.mxu0 %v1122_v29  ;;  %928 = vmatprep.subr.bf16.mxu1 %v1122_v29 }
  0xa6   :  { %909 = vmatpush3.bf16.msra.mxu0 %v980_v46  ;;  %929 = vmatpush3.bf16.msra.mxu1 %v992_v61 }
  0xa7   :  { %910 = vmatprep.subr.bf16.mxu0 %v1122_v29  ;;  %930 = vmatprep.subr.bf16.mxu1 %v1122_v29 }
  0xaa   :  { %911 = vmatpush3.bf16.msra.mxu0 %v983_v50  ;;  %931 = vmatpush3.bf16.msra.mxu1 %v993_v62 }
  0xab   :  { %912 = vmatprep.subr.bf16.mxu0 %v1122_v29  ;;  %932 = vmatprep.subr.bf16.mxu1 %v1122_v29 }
  0xae   :  { %913 = vmatpush3.bf16.msra.mxu0 %v986_v54  ;;  %933 = vmatpush3.bf16.msra.mxu1 %v994_v63 }
  0xb1   :  { %915 = vmatmul.mubr.bf16.vlgmr.msra.gmra.mrb[8].mxu0 %v1215_v44  ;;  %935 = vmatmul.mubr.bf16.vlgmr.msra.gmra.mrb[8].mxu1 %v1215_v44 }
 0x144   :  { %v801_v0 = vpop.f32.mrb[0].mxu0  ;;  %v823_v1 = vpop.f32.mrb[0].mxu1 }
 0x145   :  { %v802_v2 = vpop.f32.mrb[1].mxu0  ;;  %v824_v3 = vpop.f32.mrb[1].mxu1 }
 0x146   :  { %v803_v4 = vadd.f32 %v802_v2, %v801_v0  ;;  %v825_v5 = vadd.f32 %v824_v3, %v823_v1  ;;  %v804_v6 = vpop.f32.mrb[2].mxu0  ;;  %v826_v7 = vpop.f32.mrb[2].mxu1 }
 0x147   :  { %v805_v8 = vpop.f32.mrb[3].mxu0  ;;  %v827_v9 = vpop.f32.mrb[3].mxu1 }
 0x148   :  { %v321_v10 = vadd.f32 %v825_v5, %v803_v4 }
 0x164   :  { %v845_v11 = vpop.f32.mrb[4].mxu0  ;;  %v582_v12 = vpop.f32.mrb[4].mxu1 }
 0x165   :  { %v846_v13 = vpop.f32.mrb[5].mxu0  ;;  %v896_v14 = vpop.f32.mrb[5].mxu1 }
 0x166   :  { %v847_v15 = vadd.f32 %v846_v13, %v845_v11  ;;  %v848_v16 = vpop.f32.mrb[6].mxu0  ;;  %v585_v17 = vpop.f32.mrb[6].mxu1 }
 0x167   :  { %v849_v18 = vpop.f32.mrb[7].mxu0  ;;  %v897_v19 = vpop.f32.mrb[7].mxu1 }
 0x168   :  { %v462_v20 = vadd.f32 %v847_v15, %v321_v10 }
 0x184   :  { %v622_v21 = vpop.f32.mrb[8].mxu0  ;;  %v710_v22 = vpop.f32.mrb[8].mxu1 }
 0x185   :  { %v623_v23 = vadd.f32 %v622_v21, %v582_v12  ;;  %v916_v24 = vpop.f32.mrb[9].mxu0  ;;  %v936_v25 = vpop.f32.mrb[9].mxu1 }
 0x186   :  { %v625_v26 = vpop.f32.mrb[10].mxu0  ;;  %v713_v27 = vpop.f32.mrb[10].mxu1 }
 0x187   :  { %v716_v28 = vadd.f32 %v710_v22, %v623_v23  ;;  %v917_v29 = vpop.f32.mrb[11].mxu0  ;;  %v937_v30 = vpop.f32.mrb[11].mxu1 }
 0x189   :  { %v717_v31 = vadd.f32 %v716_v28, %v462_v20 }
 0x18b   :  { %718 = vst [vmem:[#allocation10] sm:$0xff] %v717_v31 }
 0x18c   :  { %1097 = shalt.err (!%p1094_p0)
}
 0x18d   :  { %s1098_s15 = scalar_lea.hbm %s1262_s4, 128 }
 0x18e   :  { %p1099_p1 = scmp.ne.s32.totalorder %s1262_s4, %s1098_s15  ;;  %p1102_p2 = scmp.lt.u32.totalorder %s1098_s15, %s1262_s4 }
 0x190   :  { %p1104_p3 = pnand %p1102_p2, %p1099_p1 }
 0x192   :  { %1107 = shalt.err (!%p1104_p3)
}
 0x193   :  { %728 = dma.vmem_to_hbm [thread:$0]  %s726_s11, 128, %s1262_s4, [#allocation4]  }
 0x194   :  { %1114 = dma.done.wait [#allocation4], 128  }
 0x195   :  { %1115 = vsyncadd [#allocation4], 4294967168 }
 0x196   :  { %732 = vsyncpa [#allocation3], 1 }
 0x197   :  { %733 = vsyncpa [#allocation6], 1 }
 0x198   :  { %734 = vsyncpa [#allocation9], 1 }
 0x199   :  { %735 = vsyncpa [#allocation4], 1 }

</bundles_post_ra>
